<compile_context>
chip_gen: v6e
topology: v6e:2x2x1
jax: 0.10.0
libtpu: 0.0.40
codegen_flags: <defaults>
</compile_context>

<pallas_src>
import jax
import jax.numpy as jnp
from jax.experimental import pallas as pl
from jax.experimental.pallas import tpu as pltpu

LANE = 128       # TPU lane width; combined gate+classifier output padded to this.
TB_TARGET = 256  # batch rows per grid step (multiple of 8; use 128 on v5e).


# ---------------------------------------------------------------------------
# Fused kernel: exit gate + classifier + wrapped 1x1 conv + exit mask.
# One grid step = TB batch rows.
# ---------------------------------------------------------------------------
def fused_infer_kernel(x_ref, wgc_ref, bgc_ref, wcv_ref, bcv_ref,
                       gc_ref, mod_ref):
    # x_ref   : (TB, F)    flattened batch rows of X (f32)
    # wgc_ref : (F, KPAD)  [gate | classifier | 0-pad] weight, bf16, grid-invariant
    # bgc_ref : (1, KPAD)  matching bias (gate bias in col 0), f32
    # wcv_ref : (C, F)     1x1-conv weight, w[o, c] repeated HW times along lanes
    # bcv_ref : (1, F)     1x1-conv bias,   b[o]   repeated HW times along lanes
    # gc_ref  : (TB, KPAD) out: col 0 = gate LOGIT, cols 1..K = classifier logits
    # mod_ref : (TB, F)    out: flattened conv output, zeroed on exited rows
    x = x_ref[...]                                           # (TB, F) f32

    # Gate + classifier in one lane-dense bf16 MXU pass (f32 accumulate).
    z = jnp.dot(x.astype(jnp.bfloat16), wgc_ref[...],
                preferred_element_type=jnp.float32) + bgc_ref[...]
    gc_ref[...] = z            # raw logits; sigmoid applied once in the wrapper

    # Exit decision from the logit sign (exact: sigmoid(t) > 0.5  <=>  t > 0).
    keep = (z[:, 0:1] <= 0.0).astype(jnp.float32)            # (TB, 1)

    # Wrapped 1x1 conv as C x C broadcast-FMAs on the VPU; lane slices only.
    # TODO(synk): for realistic C (>=16) switch this static unroll to
    # lax.fori_loop(..., unroll=2-4) and, if C >= 128, back onto the MXU.
    C = wcv_ref.shape[0]
    F = x.shape[1]
    HW = F // C
    for o in range(C):                                       # static unroll, C small
        prod = wcv_ref[o:o + 1, :] * x                       # (TB, F)
        acc = prod[:, 0:HW]
        for c in range(1, C):
            acc = acc + prod[:, c * HW:(c + 1) * HW]
        mod_ref[:, o * HW:(o + 1) * HW] = (
            acc + bcv_ref[0:1, o * HW:(o + 1) * HW]) * keep


def fused_infer(x2, w_comb, b_comb, w_conv_exp, b_conv_exp, tb):
    BP, F = x2.shape
    KPAD = w_comb.shape[-1]
    C = w_conv_exp.shape[0]
    grid_b = BP // tb
    # VMEM budget at these shapes: double-buffered (TB,F) x/mod tiles plus the
    # resident bf16 weight is a few MiB.  For realistic flat sizes, add a
    # trailing "arbitrary" contraction grid axis over F (tile x and w_comb) so
    # the resident weight stays inside v7x's 64 MiB VMEM.
    gc, mod2 = pl.pallas_call(
        fused_infer_kernel,
        out_shape=(
            jax.ShapeDtypeStruct((BP, KPAD), jnp.float32),
            jax.ShapeDtypeStruct((BP, F), jnp.float32),
        ),
        grid_spec=pltpu.PrefetchScalarGridSpec(
            num_scalar_prefetch=0,
            grid=(grid_b,),                                  # TB rows per step
            in_specs=[
                pl.BlockSpec((tb, F), lambda b: (b, 0)),
                # Grid-invariant operands (constant index maps) stay VMEM-resident.
                # TODO(synk): pipeline_mode=pl.Buffered(1) would single-buffer them
                # and halve their VMEM footprint for large flat sizes.
                pl.BlockSpec((F, KPAD), lambda b: (0, 0)),
                pl.BlockSpec((1, KPAD), lambda b: (0, 0)),
                pl.BlockSpec((C, F), lambda b: (0, 0)),
                pl.BlockSpec((1, F), lambda b: (0, 0)),
            ],
            out_specs=[
                pl.BlockSpec((tb, KPAD), lambda b: (b, 0)),
                pl.BlockSpec((tb, F), lambda b: (b, 0)),
            ],
        ),
        compiler_params=pltpu.CompilerParams(
            # Batch rows are independent -> shard grid steps across v7x's two
            # TensorCores; BlockSpec double-buffering pipelines the HBM traffic.
            dimension_semantics=("parallel",),
            vmem_limit_bytes=48 << 20,   # safe on v5e/v6e (128 MiB) and v7x (64 MiB)
        ),
    )(x2, w_comb, b_comb, w_conv_exp, b_conv_exp)
    return gc, mod2


# ---------------------------------------------------------------------------
# Parameters
# ---------------------------------------------------------------------------
def init_params(key, flat_size, num_outputs, channels):
    """PyTorch-equivalent params (Linear/Conv default U(-1/sqrt(fan_in), ..))."""
    ks = jax.random.split(key, 6)
    lim_lin = 1.0 / jnp.sqrt(jnp.float32(flat_size))
    wg_t = jax.random.uniform(ks[0], (flat_size, 1), jnp.float32, -lim_lin, lim_lin)
    bg = jax.random.uniform(ks[1], (1, 1), jnp.float32, -lim_lin, lim_lin)
    wc_t = jax.random.uniform(ks[2], (flat_size, num_outputs), jnp.float32, -lim_lin, lim_lin)
    bc = jax.random.uniform(ks[3], (1, num_outputs), jnp.float32, -lim_lin, lim_lin)
    lim_cv = 1.0 / jnp.sqrt(jnp.float32(channels))
    w_conv = jax.random.uniform(ks[4], (channels, channels), jnp.float32, -lim_cv, lim_cv)
    b_conv = jax.random.uniform(ks[5], (channels,), jnp.float32, -lim_cv, lim_cv)
    return dict(wg_t=wg_t, bg=bg, wc_t=wc_t, bc=bc, w_conv=w_conv, b_conv=b_conv)


def pack_fused_params(params, channels, hw):
    """One-time packing: gate + classifier concatenated into a lane-dense
    (F, KPAD) bf16 weight (col 0 = gate, cols 1..K = classifier), bias folded
    into a (1, KPAD) f32 row; 1x1-conv weight/bias pre-broadcast per spatial
    position so the kernel's VPU FMAs use lane slices only."""
    flat_size, num_outputs = params["wc_t"].shape
    assert flat_size == channels * hw
    kpad = max(LANE, pl.cdiv(1 + num_outputs, LANE) * LANE)
    w_comb = jnp.zeros((flat_size, kpad), jnp.float32)
    w_comb = w_comb.at[:, 0:1].set(params["wg_t"])
    w_comb = w_comb.at[:, 1:1 + num_outputs].set(params["wc_t"])
    b_comb = jnp.zeros((1, kpad), jnp.float32)
    b_comb = b_comb.at[:, 0:1].set(params["bg"])
    b_comb = b_comb.at[:, 1:1 + num_outputs].set(params["bc"])
    w_comb = w_comb.astype(jnp.bfloat16)   # MXU is bf16-native on v5e/v6e/v7x
    # Conv params stay f32 (VPU path; v5e has no bf16 VPU) -> conv is exact.
    w_conv_exp = jnp.repeat(params["w_conv"], hw, axis=1)          # (C, F)
    b_conv_exp = jnp.repeat(params["b_conv"], hw).reshape(1, -1)   # (1, F)
    return dict(w_comb=w_comb, b_comb=b_comb,
                w_conv_exp=w_conv_exp, b_conv_exp=b_conv_exp,
                num_outputs=num_outputs)


# ---------------------------------------------------------------------------
# Full forward (INFER state)
# ---------------------------------------------------------------------------
def optional_exit_module_infer(x, fused):
    B, C, H, W = x.shape
    K = fused["num_outputs"]
    F = C * H * W
    x2 = x.reshape(B, F)                      # == torch.flatten(X, start_dim=1)

    # Batch rows per grid step: fill the MXU M dimension and make per-step
    # DMAs large; pad the batch when it exceeds the tile.
    if B <= TB_TARGET:
        tb, bp = B, B
    else:
        tb = TB_TARGET
        bp = pl.cdiv(B, tb) * tb
        x2 = jnp.pad(x2, ((0, bp - B), (0, 0)))

    gc, mod2 = fused_infer(x2, fused["w_comb"], fused["b_comb"],
                           fused["w_conv_exp"], fused["b_conv_exp"], tb)
    gc = gc[:B]
    logit = gc[:, 0]
    exit_confidences = jax.nn.sigmoid(logit)   # (B,)
    exit_taken = logit > 0.0                   # == sigmoid(logit) > 0.5, exact
    y_hat = gc[:, 1:1 + K]                     # (B, K), dense (see TODO at top)
    module_out = mod2[:B].reshape(B, C, H, W)  # exited rows already zeroed
    return exit_confidences, exit_taken, y_hat, module_out


if __name__ == "__main__":
    B, C, H, W = 2, 4, 16, 16
    num_outputs = 10
    flat_size = C * H * W

    key = jax.random.PRNGKey(0)
    kx, kp = jax.random.split(key)
    x = jax.random.normal(kx, (B, C, H, W), jnp.float32)
    params = init_params(kp, flat_size, num_outputs, C)
    fused = pack_fused_params(params, C, H * W)

    conf, taken, y_hat, mod_out = optional_exit_module_infer(x, fused)
    jax.block_until_ready((conf, taken, y_hat, mod_out))

    assert conf.shape == (B,)
    assert taken.shape == (B,)
    assert y_hat.shape == (B, num_outputs)
    assert mod_out.shape == (B, C, H, W)

    # Pure-JAX reference (loose tolerance: the kernel's gate/classifier matmul
    # runs in bf16 on the MXU; the conv is exact f32).
    x_flat = x.reshape(B, flat_size)
    conf_ref = jax.nn.sigmoid(x_flat @ params["wg_t"] + params["bg"]).reshape(B)
    yhat_ref = x_flat @ params["wc_t"] + params["bc"]
    conv_ref = (jnp.einsum("oc,bcx->box", params["w_conv"],
                           x.reshape(B, C, H * W))
                + params["b_conv"][None, :, None]).reshape(B, C, H, W)
    # Use the kernel's own mask so a confidence at the 0.5 boundary can't flip
    # the comparison between kernel and reference.
    mod_ref = conv_ref * jnp.logical_not(taken).astype(x.dtype)[:, None, None, None]
    assert bool(jnp.allclose(conf, conf_ref, rtol=2e-2, atol=2e-2))
    assert bool(jnp.allclose(y_hat, yhat_ref, rtol=2e-2, atol=2e-2))
    assert bool(jnp.allclose(mod_out, mod_ref, rtol=2e-2, atol=2e-2))

    print("KERNEL_OK")
</pallas_src>

<mosaic_0001>
module attributes {stable_mosaic.version = 11 : i64} {
  func.func @fused_infer_kernel(%arg0: i32, %arg1: memref<2x1024xf32, #tpu.memory_space<vmem>>, %arg2: memref<1024x128xbf16, #tpu.memory_space<vmem>>, %arg3: memref<1x128xf32, #tpu.memory_space<vmem>>, %arg4: memref<4x1024xf32, #tpu.memory_space<vmem>>, %arg5: memref<1x1024xf32, #tpu.memory_space<vmem>>, %arg6: memref<2x128xf32, #tpu.memory_space<vmem>>, %arg7: memref<2x1024xf32, #tpu.memory_space<vmem>>) attributes {dimension_semantics = [#tpu.dimension_semantics<parallel>], iteration_bounds = array<i64: 1>, scalar_prefetch = 0 : i64, scratch_operands = 0 : i64, tpu.core_type = #tpu.core_type<tc>, window_params = [{transform_indices = @transform_0, window_bounds = array<i64: 2, 1024>}, {pipeline_mode = #tpu.pipeline_mode<synchronous>, transform_indices = @transform_1, window_bounds = array<i64: 1024, 128>}, {pipeline_mode = #tpu.pipeline_mode<synchronous>, transform_indices = @transform_2, window_bounds = array<i64: 1, 128>}, {pipeline_mode = #tpu.pipeline_mode<synchronous>, transform_indices = @transform_3, window_bounds = array<i64: 4, 1024>}, {pipeline_mode = #tpu.pipeline_mode<synchronous>, transform_indices = @transform_4, window_bounds = array<i64: 1, 1024>}, {transform_indices = @transform_5, window_bounds = array<i64: 2, 128>}, {transform_indices = @transform_6, window_bounds = array<i64: 2, 1024>}]} {
    %c0 = arith.constant 0 : index
    %c0_0 = arith.constant 0 : index
    %0 = vector.load %arg1[%c0, %c0_0] : memref<2x1024xf32, #tpu.memory_space<vmem>>, vector<2x1024xf32>
    %1 = arith.truncf %0 : vector<2x1024xf32> to vector<2x1024xbf16>
    %c0_1 = arith.constant 0 : index
    %c0_2 = arith.constant 0 : index
    %2 = vector.load %arg2[%c0_1, %c0_2] : memref<1024x128xbf16, #tpu.memory_space<vmem>>, vector<1024x128xbf16>
    %cst = arith.constant dense<0.000000e+00> : vector<2x128xf32>
    %3 = tpu.matmul %1, %2, %cst {dimension_numbers = #tpu.dot_dimension_numbers<[1], [0], [0], [1], [0, 0, 1, 1], [], []>} : vector<2x1024xbf16>, vector<1024x128xbf16>, vector<2x128xf32> -> vector<2x128xf32>
    %c0_3 = arith.constant 0 : index
    %c0_4 = arith.constant 0 : index
    %4 = vector.load %arg3[%c0_3, %c0_4] : memref<1x128xf32, #tpu.memory_space<vmem>>, vector<1x128xf32>
    %5 = vector.broadcast %4 : vector<1x128xf32> to vector<2x128xf32>
    %6 = arith.addf %3, %5 : vector<2x128xf32>
    %c0_5 = arith.constant 0 : index
    %c0_6 = arith.constant 0 : index
    %7 = vector.load %arg6[%c0_5, %c0_6] : memref<2x128xf32, #tpu.memory_space<vmem>>, vector<2x128xf32>
    tpu.vector_store %arg6[%c0_5, %c0_6], %6 {strides = array<i32>} : memref<2x128xf32, #tpu.memory_space<vmem>>, vector<2x128xf32>,
    %8 = vector.extract_strided_slice %6 {offsets = [0, 0], sizes = [2, 1], strides = [1, 1]} : vector<2x128xf32> to vector<2x1xf32>
    %cst_7 = arith.constant 0.000000e+00 : f32
    %9 = vector.broadcast %cst_7 : f32 to vector<2x1xf32>
    %10 = arith.cmpf ole, %8, %9 : vector<2x1xf32>
    %11 = arith.extui %10 : vector<2x1xi1> to vector<2x1xi32>
    %12 = arith.sitofp %11 : vector<2x1xi32> to vector<2x1xf32>
    %c0_8 = arith.constant 0 : index
    %c0_9 = arith.constant 0 : index
    %13 = vector.load %arg4[%c0_8, %c0_9] : memref<4x1024xf32, #tpu.memory_space<vmem>>, vector<1x1024xf32>
    %14 = vector.broadcast %13 : vector<1x1024xf32> to vector<2x1024xf32>
    %15 = arith.mulf %14, %0 : vector<2x1024xf32>
    %16 = vector.extract_strided_slice %15 {offsets = [0, 0], sizes = [2, 256], strides = [1, 1]} : vector<2x1024xf32> to vector<2x256xf32>
    %17 = vector.extract_strided_slice %15 {offsets = [0, 256], sizes = [2, 256], strides = [1, 1]} : vector<2x1024xf32> to vector<2x256xf32>
    %18 = arith.addf %16, %17 : vector<2x256xf32>
    %19 = vector.extract_strided_slice %15 {offsets = [0, 512], sizes = [2, 256], strides = [1, 1]} : vector<2x1024xf32> to vector<2x256xf32>
    %20 = arith.addf %18, %19 : vector<2x256xf32>
    %21 = vector.extract_strided_slice %15 {offsets = [0, 768], sizes = [2, 256], strides = [1, 1]} : vector<2x1024xf32> to vector<2x256xf32>
    %22 = arith.addf %20, %21 : vector<2x256xf32>
    %c0_10 = arith.constant 0 : index
    %c0_11 = arith.constant 0 : index
    %23 = vector.load %arg5[%c0_10, %c0_11] : memref<1x1024xf32, #tpu.memory_space<vmem>>, vector<1x256xf32>
    %24 = vector.broadcast %23 : vector<1x256xf32> to vector<2x256xf32>
    %25 = arith.addf %22, %24 : vector<2x256xf32>
    %26 = vector.broadcast %12 : vector<2x1xf32> to vector<2x256xf32>
    %27 = arith.mulf %25, %26 : vector<2x256xf32>
    %c0_12 = arith.constant 0 : index
    %c0_13 = arith.constant 0 : index
    %28 = vector.load %arg7[%c0_12, %c0_13] : memref<2x1024xf32, #tpu.memory_space<vmem>>, vector<2x256xf32>
    tpu.vector_store %arg7[%c0_12, %c0_13], %27 {strides = array<i32>} : memref<2x1024xf32, #tpu.memory_space<vmem>>, vector<2x256xf32>,
    %c1 = arith.constant 1 : index
    %c0_14 = arith.constant 0 : index
    %29 = vector.load %arg4[%c1, %c0_14] : memref<4x1024xf32, #tpu.memory_space<vmem>>, vector<1x1024xf32>
    %30 = vector.broadcast %29 : vector<1x1024xf32> to vector<2x1024xf32>
    %31 = arith.mulf %30, %0 : vector<2x1024xf32>
    %32 = vector.extract_strided_slice %31 {offsets = [0, 0], sizes = [2, 256], strides = [1, 1]} : vector<2x1024xf32> to vector<2x256xf32>
    %33 = vector.extract_strided_slice %31 {offsets = [0, 256], sizes = [2, 256], strides = [1, 1]} : vector<2x1024xf32> to vector<2x256xf32>
    %34 = arith.addf %32, %33 : vector<2x256xf32>
    %35 = vector.extract_strided_slice %31 {offsets = [0, 512], sizes = [2, 256], strides = [1, 1]} : vector<2x1024xf32> to vector<2x256xf32>
    %36 = arith.addf %34, %35 : vector<2x256xf32>
    %37 = vector.extract_strided_slice %31 {offsets = [0, 768], sizes = [2, 256], strides = [1, 1]} : vector<2x1024xf32> to vector<2x256xf32>
    %38 = arith.addf %36, %37 : vector<2x256xf32>
    %c0_15 = arith.constant 0 : index
    %c256 = arith.constant 256 : index
    %39 = vector.load %arg5[%c0_15, %c256] : memref<1x1024xf32, #tpu.memory_space<vmem>>, vector<1x256xf32>
    %40 = vector.broadcast %39 : vector<1x256xf32> to vector<2x256xf32>
    %41 = arith.addf %38, %40 : vector<2x256xf32>
    %42 = vector.broadcast %12 : vector<2x1xf32> to vector<2x256xf32>
    %43 = arith.mulf %41, %42 : vector<2x256xf32>
    %c0_16 = arith.constant 0 : index
    %c256_17 = arith.constant 256 : index
    %44 = vector.load %arg7[%c0_16, %c256_17] : memref<2x1024xf32, #tpu.memory_space<vmem>>, vector<2x256xf32>
    tpu.vector_store %arg7[%c0_16, %c256_17], %43 {strides = array<i32>} : memref<2x1024xf32, #tpu.memory_space<vmem>>, vector<2x256xf32>,
    %c2 = arith.constant 2 : index
    %c0_18 = arith.constant 0 : index
    %45 = vector.load %arg4[%c2, %c0_18] : memref<4x1024xf32, #tpu.memory_space<vmem>>, vector<1x1024xf32>
    %46 = vector.broadcast %45 : vector<1x1024xf32> to vector<2x1024xf32>
    %47 = arith.mulf %46, %0 : vector<2x1024xf32>
    %48 = vector.extract_strided_slice %47 {offsets = [0, 0], sizes = [2, 256], strides = [1, 1]} : vector<2x1024xf32> to vector<2x256xf32>
    %49 = vector.extract_strided_slice %47 {offsets = [0, 256], sizes = [2, 256], strides = [1, 1]} : vector<2x1024xf32> to vector<2x256xf32>
    %50 = arith.addf %48, %49 : vector<2x256xf32>
    %51 = vector.extract_strided_slice %47 {offsets = [0, 512], sizes = [2, 256], strides = [1, 1]} : vector<2x1024xf32> to vector<2x256xf32>
    %52 = arith.addf %50, %51 : vector<2x256xf32>
    %53 = vector.extract_strided_slice %47 {offsets = [0, 768], sizes = [2, 256], strides = [1, 1]} : vector<2x1024xf32> to vector<2x256xf32>
    %54 = arith.addf %52, %53 : vector<2x256xf32>
    %c0_19 = arith.constant 0 : index
    %c512 = arith.constant 512 : index
    %55 = vector.load %arg5[%c0_19, %c512] : memref<1x1024xf32, #tpu.memory_space<vmem>>, vector<1x256xf32>
    %56 = vector.broadcast %55 : vector<1x256xf32> to vector<2x256xf32>
    %57 = arith.addf %54, %56 : vector<2x256xf32>
    %58 = vector.broadcast %12 : vector<2x1xf32> to vector<2x256xf32>
    %59 = arith.mulf %57, %58 : vector<2x256xf32>
    %c0_20 = arith.constant 0 : index
    %c512_21 = arith.constant 512 : index
    %60 = vector.load %arg7[%c0_20, %c512_21] : memref<2x1024xf32, #tpu.memory_space<vmem>>, vector<2x256xf32>
    tpu.vector_store %arg7[%c0_20, %c512_21], %59 {strides = array<i32>} : memref<2x1024xf32, #tpu.memory_space<vmem>>, vector<2x256xf32>,
    %c3 = arith.constant 3 : index
    %c0_22 = arith.constant 0 : index
    %61 = vector.load %arg4[%c3, %c0_22] : memref<4x1024xf32, #tpu.memory_space<vmem>>, vector<1x1024xf32>
    %62 = vector.broadcast %61 : vector<1x1024xf32> to vector<2x1024xf32>
    %63 = arith.mulf %62, %0 : vector<2x1024xf32>
    %64 = vector.extract_strided_slice %63 {offsets = [0, 0], sizes = [2, 256], strides = [1, 1]} : vector<2x1024xf32> to vector<2x256xf32>
    %65 = vector.extract_strided_slice %63 {offsets = [0, 256], sizes = [2, 256], strides = [1, 1]} : vector<2x1024xf32> to vector<2x256xf32>
    %66 = arith.addf %64, %65 : vector<2x256xf32>
    %67 = vector.extract_strided_slice %63 {offsets = [0, 512], sizes = [2, 256], strides = [1, 1]} : vector<2x1024xf32> to vector<2x256xf32>
    %68 = arith.addf %66, %67 : vector<2x256xf32>
    %69 = vector.extract_strided_slice %63 {offsets = [0, 768], sizes = [2, 256], strides = [1, 1]} : vector<2x1024xf32> to vector<2x256xf32>
    %70 = arith.addf %68, %69 : vector<2x256xf32>
    %c0_23 = arith.constant 0 : index
    %c768 = arith.constant 768 : index
    %71 = vector.load %arg5[%c0_23, %c768] : memref<1x1024xf32, #tpu.memory_space<vmem>>, vector<1x256xf32>
    %72 = vector.broadcast %71 : vector<1x256xf32> to vector<2x256xf32>
    %73 = arith.addf %70, %72 : vector<2x256xf32>
    %74 = vector.broadcast %12 : vector<2x1xf32> to vector<2x256xf32>
    %75 = arith.mulf %73, %74 : vector<2x256xf32>
    %c0_24 = arith.constant 0 : index
    %c768_25 = arith.constant 768 : index
    %76 = vector.load %arg7[%c0_24, %c768_25] : memref<2x1024xf32, #tpu.memory_space<vmem>>, vector<2x256xf32>
    tpu.vector_store %arg7[%c0_24, %c768_25], %75 {strides = array<i32>} : memref<2x1024xf32, #tpu.memory_space<vmem>>, vector<2x256xf32>,
    return
  }
  func.func @transform_0(%arg0: i32) -> (i32, i32) {
    %c0_i32 = arith.constant 0 : i32
    %c0_i32_0 = arith.constant 0 : i32
    return %arg0, %c0_i32 : i32, i32
  }
  func.func @transform_1(%arg0: i32) -> (i32, i32) {
    %c0_i32 = arith.constant 0 : i32
    %c0_i32_0 = arith.constant 0 : i32
    %c0_i32_1 = arith.constant 0 : i32
    return %c0_i32, %c0_i32_0 : i32, i32
  }
  func.func @transform_2(%arg0: i32) -> (i32, i32) {
    %c0_i32 = arith.constant 0 : i32
    %c0_i32_0 = arith.constant 0 : i32
    %c0_i32_1 = arith.constant 0 : i32
    return %c0_i32, %c0_i32_0 : i32, i32
  }
  func.func @transform_3(%arg0: i32) -> (i32, i32) {
    %c0_i32 = arith.constant 0 : i32
    %c0_i32_0 = arith.constant 0 : i32
    %c0_i32_1 = arith.constant 0 : i32
    return %c0_i32, %c0_i32_0 : i32, i32
  }
  func.func @transform_4(%arg0: i32) -> (i32, i32) {
    %c0_i32 = arith.constant 0 : i32
    %c0_i32_0 = arith.constant 0 : i32
    %c0_i32_1 = arith.constant 0 : i32
    return %c0_i32, %c0_i32_0 : i32, i32
  }
  func.func @transform_5(%arg0: i32) -> (i32, i32) {
    %c0_i32 = arith.constant 0 : i32
    %c0_i32_0 = arith.constant 0 : i32
    return %arg0, %c0_i32 : i32, i32
  }
  func.func @transform_6(%arg0: i32) -> (i32, i32) {
    %c0_i32 = arith.constant 0 : i32
    %c0_i32_0 = arith.constant 0 : i32
    return %arg0, %c0_i32 : i32, i32
  }
}

</mosaic_0001>

<bundles_post_ra>
// kernel: tpu_custom_call.1
= control target key start
LH: loop header
LB: loop body
LE: loop exit
PB: predicated region body
PF: predicated region fallthrough
CT: control target
= control target key end

     0   :  { %12 = vsyncpa [#allocation3], 0  ;;  %s1782_s0 = inlined_call_operand.hbm [shape: f32[2,1024], index: 0, kind: input, shape index: {}]   ;;  %s1783_s1 = inlined_call_operand.hbm [shape: bf16[1024,128], index: 1, kind: input, shape index: {}]   ;;  %s1784_s2 = inlined_call_operand.vmem [shape: f32[1,128], index: 2, kind: input, shape index: {}]   ;;  %s1785_s3 = inlined_call_operand.hbm [shape: f32[4,1024], index: 3, kind: input, shape index: {}]   ;;  %s1786_s4 = inlined_call_operand.hbm [shape: f32[1,1024], index: 4, kind: input, shape index: {}]   ;;  %s1787_s5 = inlined_call_operand.hbm [shape: f32[2,128], index: 5, kind: output, shape index: {0}]   ;;  %s1788_s6 = inlined_call_operand.hbm [shape: f32[2,1024], index: 6, kind: output, shape index: {1}]  }
   0x1   :  { %13 = vsyncpa [#allocation6], 0 }
   0x2   :  { %14 = vsyncpa [#allocation9], 0 }
   0x3   :  { %15 = vsyncpa [#allocation4], 0 }
   0x4   :  { %16 = vsyncpa [#allocation12], 0  ;;  %s1552_s21 = smov [#allocation5]  }
   0x5   :  { %s32_s22 = sshll.u32 %s1552_s21, 4  ;;  %s33_s22 = int_to_ptr.vmem [resolvable:$true] %s32_s22 }
   0x6   :  { %s1430_s23 = scalar_lea.vmem %s33_s22, 8192  ;;  %p1435_p1 = scmp.lt.s32.totalorder %s33_s22, %s33_s22 }
   0x7   :  { %p1431_p0 = scmp.ne.s32.totalorder %s33_s22, %s1430_s23  ;;  %p1436_p2 = scmp.lt.s32.totalorder %s1430_s23, %s1430_s23 }
   0x9   :  { %p1437_p3 = por %p1436_p2, %p1435_p1 }
   0xb   :  { %p1438_p4 = pnand %p1437_p3, %p1431_p0 }
   0xd   :  { %1441 = shalt.err (!%p1438_p4)
}
   0xe   :  { %s1553_s24 = smov 64   ;;  %s1554_s25 = smov 4  }
   0xf   :  { %38 = dma.hbm_to_vmem [thread:$0]  %s1783_s1, 8192, %s33_s22, [#allocation6], %s1553_s24, %s1553_s24, %s1554_s25  }
  0x10   :  { %s1555_s28 = smov [#allocation2]   ;;  %s1556_s30 = smov [#allocation7]  }
  0x11   :  { %s23_s29 = sshll.u32 %s1555_s28, 4  ;;  %s47_s7 = sshll.u32 %s1556_s30, 4  ;;  %s24_s29 = int_to_ptr.vmem [resolvable:$true] %s23_s29  ;;  %s48_s7 = int_to_ptr.vmem [resolvable:$true] %s47_s7 }
  0x12   :  { %s1450_s8 = scalar_lea.vmem %s24_s29, 256  ;;  %p1455_p6 = scmp.lt.s32.totalorder %s24_s29, %s24_s29 }
  0x13   :  { %p1451_p5 = scmp.ne.s32.totalorder %s24_s29, %s1450_s8  ;;  %p1456_p7 = scmp.lt.s32.totalorder %s1450_s8, %s1450_s8 }
  0x15   :  { %p1457_p8 = por %p1456_p7, %p1455_p6 }
  0x17   :  { %p1458_p9 = pnand %p1457_p8, %p1451_p5 }
  0x19   :  { %1461 = shalt.err (!%p1458_p9)
}
  0x1a   :  { %26 = dma.hbm_to_vmem [thread:$0]  %s1782_s0, 256, %s24_s29, [#allocation3]  }
  0x1b   :  { %s1470_s11 = scalar_lea.vmem %s48_s7, 512  ;;  %p1475_p11 = scmp.lt.s32.totalorder %s48_s7, %s48_s7 }
  0x1c   :  { %p1471_p10 = scmp.ne.s32.totalorder %s48_s7, %s1470_s11  ;;  %p1476_p12 = scmp.lt.s32.totalorder %s1470_s11, %s1470_s11 }
  0x1e   :  { %p1477_p13 = por %p1476_p12, %p1475_p11 }
  0x20   :  { %p1478_p0 = pnand %p1477_p13, %p1471_p10 }
  0x22   :  { %1481 = shalt.err (!%p1478_p0)
}
  0x23   :  { %50 = dma.hbm_to_vmem [thread:$0]  %s1785_s3, 512, %s48_s7, [#allocation6]  }
  0x24   :  { %s1557_s13 = smov [#allocation8]  }
  0x25   :  { %s57_s14 = sshll.u32 %s1557_s13, 4  ;;  %s58_s14 = int_to_ptr.vmem [resolvable:$true] %s57_s14 }
  0x26   :  { %s1490_s15 = scalar_lea.vmem %s58_s14, 128  ;;  %p1495_p2 = scmp.lt.s32.totalorder %s58_s14, %s58_s14 }
  0x27   :  { %p1491_p1 = scmp.ne.s32.totalorder %s58_s14, %s1490_s15  ;;  %p1496_p3 = scmp.lt.s32.totalorder %s1490_s15, %s1490_s15 }
  0x29   :  { %p1497_p4 = por %p1496_p3, %p1495_p2 }
  0x2b   :  { %p1498_p5 = pnand %p1497_p4, %p1491_p1 }
  0x2d   :  { %1501 = shalt.err (!%p1498_p5)
}
  0x2e   :  { %60 = dma.hbm_to_vmem [thread:$0]  %s1786_s4, 128, %s58_s14, [#allocation9]  }
  0x2f   :  { %1542 = dma.done.wait [#allocation3], 256  }
  0x30   :  { %1543 = vsyncadd [#allocation3], 4294967040 }
  0x31   :  { %1544 = dma.done.wait [#allocation6], 8704  }
  0x32   :  { %1545 = vsyncadd [#allocation6], 4294958592 }
  0x33   :  { %1546 = dma.done.wait [#allocation9], 128  }
  0x34   :  { %1547 = vsyncadd [#allocation9], 4294967168  ;;  %v1356_v0 = vld [vmem:[#allocation5 + $0x78] sm:$0xff]   ;;  %v1360_v4 = vld [vmem:[#allocation5 + $0x70] sm:$0xff]   ;;  %v1558_v22 = vmov 1983009808   ;;  %v82_v24 = vlaneseq }
  0x35   :  { %v1357_v1 = vld [vmem:[#allocation5 + $0xf8] sm:$0xff]   ;;  %1256 = vmatprep.subr.bf16.mxu0 %v1356_v0  ;;  %v1361_v5 = vld [vmem:[#allocation5 + $0xf0] sm:$0xff]   ;;  %v1364_v8 = vld [vmem:[#allocation5 + $0x68] sm:$0xff]   ;;  %v80_v23 = vunpack.c.l.s4 %v1558_v22  ;;  %s1560_s17 = smov [#allocation10]  }
  0x36   :  { %v1358_v2 = vld [vmem:[#allocation5 + $0x38] sm:$0xff]   ;;  %1278 = vmatprep.subr.bf16.mxu1 %v1357_v1  ;;  %v1362_v6 = vld [vmem:[#allocation5 + $0x30] sm:$0xff]   ;;  %v1365_v9 = vld [vmem:[#allocation5 + $0xe8] sm:$0xff]   ;;  %v1610_v30 = vshrl.u32 %v82_v24, 7  ;;  %s1161_s18 = sshll.u32 %s1560_s17, 4  ;;  %s1162_s18 = int_to_ptr.vmem [resolvable:$true] %s1161_s18 }
  0x37   :  { %v1359_v3 = vld [vmem:[#allocation5 + $0xb8] sm:$0xff]   ;;  %1257 = vmatpush3.bf16.msra.mxu0 %v1358_v2  ;;  %v1363_v7 = vld [vmem:[#allocation5 + $0xb0] sm:$0xff]   ;;  %v1366_v10 = vld [vmem:[#allocation5 + $0x28] sm:$0xff]   ;;  %v81_v29 = vunpack.c.0.s8 %v80_v23  ;;  %p1507_p7 = scmp.lt.s32.totalorder %s1162_s18, %s1162_s18 }
  0x38   :  { %1279 = vmatpush3.bf16.msra.mxu1 %v1359_v3  ;;  %1258 = vmatprep.subr.bf16.mxu0 %v1360_v4  ;;  %v1367_v11 = vld [vmem:[#allocation5 + $0xa8] sm:$0xff]   ;;  %v1368_v12 = vld [vmem:[#allocation5 + $0x60] sm:$0xff]   ;;  %v1372_v16 = vld [vmem:[#allocation5 + $0x58] sm:$0xff]  }
  0x39   :  { %1280 = vmatprep.subr.bf16.mxu1 %v1361_v5  ;;  %v1369_v13 = vld [vmem:[#allocation5 + $0xe0] sm:$0xff]   ;;  %v1373_v17 = vld [vmem:[#allocation5 + $0xd8] sm:$0xff]   ;;  %v1376_v20 = vld [vmem:[#allocation5 + $0x50] sm:$0xff]   ;;  %v1613_v35 = vsub.s32 %v81_v29, %v1610_v30 }
  0x3a   :  { %v1370_v14 = vld [vmem:[#allocation5 + $0x20] sm:$0xff]   ;;  %v1374_v18 = vld [vmem:[#allocation5 + $0x18] sm:$0xff]   ;;  %v1377_v21 = vld [vmem:[#allocation5 + $0xd0] sm:$0xff]  }
  0x3b   :  { %1259 = vmatpush3.bf16.msra.mxu0 %v1362_v6  ;;  %v1371_v15 = vld [vmem:[#allocation5 + $0xa0] sm:$0xff]   ;;  %v1375_v19 = vld [vmem:[#allocation5 + $0x98] sm:$0xff]   ;;  %v1378_v25 = vld [vmem:[#allocation5 + $0x10] sm:$0xff]  }
  0x3c   :  { %1281 = vmatpush3.bf16.msra.mxu1 %v1363_v7  ;;  %1260 = vmatprep.subr.bf16.mxu0 %v1364_v8  ;;  %v1379_v26 = vld [vmem:[#allocation5 + $0x90] sm:$0xff]   ;;  %v1380_v27 = vld [vmem:[#allocation5 + $0x48] sm:$0xff]   ;;  %v1384_v33 = vld [vmem:[#allocation5 + $0x40] sm:$0xff]  }
  0x3d   :  { %1282 = vmatprep.subr.bf16.mxu1 %v1365_v9  ;;  %v1381_v28 = vld [vmem:[#allocation5 + $0xc8] sm:$0xff]   ;;  %v1385_v34 = vld [vmem:[#allocation5 + $0xc0] sm:$0xff]   ;;  %v74_v38 = vld [vmem:[#allocation2] sm:$0xff] }
  0x3e   :  { %v1382_v31 = vld [vmem:[#allocation5 + $0x8] sm:$0xff]   ;;  %v1386_v36 = vld [vmem:[#allocation5] sm:$0xff]   ;;  %v1616_v39 = vrot.slane %v74_v38, %v1613_v35  ;;  %v78_v40 = vcombine.high %v74_v38, %v74_v38  ;;  %v1389_v41 = vld [vmem:[#allocation5 + $0x178] sm:$0xff]  }
  0x3f   :  { %1261 = vmatpush3.bf16.msra.mxu0 %v1366_v10  ;;  %v1383_v32 = vld [vmem:[#allocation5 + $0x88] sm:$0xff]   ;;  %v1387_v37 = vld [vmem:[#allocation5 + $0x80] sm:$0xff]   ;;  %v1390_v42 = vld [vmem:[#allocation5 + $0x1f8] sm:$0xff]  }
  0x40   :  { %1283 = vmatpush3.bf16.msra.mxu1 %v1367_v11  ;;  %1262 = vmatprep.subr.bf16.mxu0 %v1368_v12  ;;  %v1620_v43 = vcombine.high %v1616_v39, %v1616_v39  ;;  %v1623_v44 = vrot.slane %v78_v40, %v1613_v35  ;;  %v120_v45 = vpack.c.bf16 %v1616_v39, %v1616_v39  ;;  %v1391_v48 = vld [vmem:[#allocation5 + $0x138] sm:$0xff]   ;;  %v1393_v50 = vld [vmem:[#allocation5 + $0x170] sm:$0xff]   ;;  %v1397_v55 = vld [vmem:[#allocation5 + $0x168] sm:$0xff]  }
  0x41   :  { %1284 = vmatprep.subr.bf16.mxu1 %v1369_v13  ;;  %v1392_v52 = vld [vmem:[#allocation5 + $0x1b8] sm:$0xff]   ;;  %v1394_v53 = vld [vmem:[#allocation5 + $0x1f0] sm:$0xff]   ;;  %v1398_v57 = vld [vmem:[#allocation5 + $0x1e8] sm:$0xff]  }
  0x42   :  { %v121_v46 = vpack.c.bf16 %v1620_v43, %v1620_v43  ;;  %v1631_v47 = vcombine.high %v1623_v44, %v1623_v44  ;;  %v122_v49 = vpack.c.bf16 %v1623_v44, %v1623_v44  ;;  %v1395_v54 = vld [vmem:[#allocation5 + $0x130] sm:$0xff]   ;;  %v1399_v58 = vld [vmem:[#allocation5 + $0x128] sm:$0xff]   ;;  %v1401_v59 = vld [vmem:[#allocation5 + $0x160] sm:$0xff]  }
  0x43   :  { %1263 = vmatpush3.bf16.msra.mxu0 %v1370_v14  ;;  %v1396_v56 = vld [vmem:[#allocation5 + $0x1b0] sm:$0xff]   ;;  %v1400_v60 = vld [vmem:[#allocation5 + $0x1a8] sm:$0xff]   ;;  %v1402_v61 = vld [vmem:[#allocation5 + $0x1e0] sm:$0xff]  }
  0x44   :  { %1285 = vmatpush3.bf16.msra.mxu1 %v1371_v15  ;;  %1264 = vmatprep.subr.bf16.mxu0 %v1372_v16  ;;  %v123_v51 = vpack.c.bf16 %v1631_v47, %v1631_v47  ;;  %v1403_v62 = vld [vmem:[#allocation5 + $0x120] sm:$0xff]   ;;  %v1405_v63 = vld [vmem:[#allocation5 + $0x158] sm:$0xff]   ;;  %v1409_v3 = vld [vmem:[#allocation5 + $0x150] sm:$0xff]  }
  0x45   :  { %1286 = vmatprep.subr.bf16.mxu1 %v1373_v17  ;;  %679 = vmatprep.mubr.bf16.mxu0 %v121_v46  ;;  %v1404_v0 = vld [vmem:[#allocation5 + $0x1a0] sm:$0xff]   ;;  %v1406_v1 = vld [vmem:[#allocation5 + $0x1d8] sm:$0xff]   ;;  %v1410_v5 = vld [vmem:[#allocation5 + $0x1d0] sm:$0xff]  }
  0x46   :  { %719 = vmatprep.mubr.bf16.mxu1 %v123_v51  ;;  %v1407_v2 = vld [vmem:[#allocation5 + $0x118] sm:$0xff]   ;;  %v1411_v6 = vld [vmem:[#allocation5 + $0x110] sm:$0xff]   ;;  %v1413_v7 = vld [vmem:[#allocation5 + $0x148] sm:$0xff]  }
  0x47   :  { %1265 = vmatpush3.bf16.msra.mxu0 %v1374_v18  ;;  %v1408_v4 = vld [vmem:[#allocation5 + $0x198] sm:$0xff]   ;;  %v1412_v8 = vld [vmem:[#allocation5 + $0x190] sm:$0xff]   ;;  %v1414_v9 = vld [vmem:[#allocation5 + $0x1c8] sm:$0xff]  }
  0x48   :  { %1287 = vmatpush3.bf16.msra.mxu1 %v1375_v19  ;;  %1266 = vmatprep.subr.bf16.mxu0 %v1376_v20  ;;  %v1415_v10 = vld [vmem:[#allocation5 + $0x108] sm:$0xff]   ;;  %v1417_v11 = vld [vmem:[#allocation5 + $0x140] sm:$0xff]   ;;  %v75_v14 = vld [vmem:[#allocation2 + $0x8] sm:$0xff] }
  0x49   :  { %1288 = vmatprep.subr.bf16.mxu1 %v1377_v21  ;;  %v1416_v12 = vld [vmem:[#allocation5 + $0x188] sm:$0xff]   ;;  %v1418_v13 = vld [vmem:[#allocation5 + $0x1c0] sm:$0xff]   ;;  %v1638_v16 = vrot.slane %v75_v14, %v1613_v35  ;;  %v95_v17 = vcombine.high %v75_v14, %v75_v14 }
  0x4a   :  { %v1419_v15 = vld [vmem:[#allocation5 + $0x100] sm:$0xff]  }
  0x4b   :  { %1267 = vmatpush3.bf16.msra.mxu0 %v1378_v25  ;;  %v1420_v18 = vld [vmem:[#allocation5 + $0x180] sm:$0xff]   ;;  %v1642_v19 = vcombine.high %v1638_v16, %v1638_v16  ;;  %v1645_v20 = vrot.slane %v95_v17, %v1613_v35  ;;  %v124_v21 = vpack.c.bf16 %v1638_v16, %v1638_v16 }
  0x4c   :  { %1289 = vmatpush3.bf16.msra.mxu1 %v1379_v26  ;;  %1268 = vmatprep.subr.bf16.mxu0 %v1380_v27  ;;  %v1559_v26 = vmov 0  }
  0x4d   :  { %1290 = vmatprep.subr.bf16.mxu1 %v1381_v28  ;;  %v125_v22 = vpack.c.bf16 %v1642_v19, %v1642_v19  ;;  %v1653_v23 = vcombine.high %v1645_v20, %v1645_v20  ;;  %v126_v24 = vpack.c.bf16 %v1645_v20, %v1645_v20  ;;  %1355 = vset.pattern.permute.xlu0 %v1559_v26 }
  0x4f   :  { %1269 = vmatpush3.bf16.msra.mxu0 %v1382_v31  ;;  %v127_v25 = vpack.c.bf16 %v1653_v23, %v1653_v23 }
  0x50   :  { %1291 = vmatpush3.bf16.msra.mxu1 %v1383_v32  ;;  %1270 = vmatprep.subr.bf16.mxu0 %v1384_v33 }
  0x51   :  { %1292 = vmatprep.subr.bf16.mxu1 %v1385_v34 }
  0x53   :  { %1271 = vmatpush3.bf16.msra.mxu0 %v1386_v36 }
  0x54   :  { %1293 = vmatpush3.bf16.msra.mxu1 %v1387_v37  ;;  %1300 = vmatprep.subr.bf16.mxu0 %v1389_v41  ;;  %v1186_v37 = vld [vmem:[%s1784_s2] ss:$0 sm:$0xff]  ;;  %s1502_s2 = scalar_lea.vmem %s1162_s18, 32 }
  0x55   :  { %1322 = vmatprep.subr.bf16.mxu1 %v1390_v42  ;;  %p1503_p6 = scmp.ne.s32.totalorder %s1162_s18, %s1502_s2  ;;  %p1508_p8 = scmp.lt.s32.totalorder %s1502_s2, %s1502_s2 }
  0x56   :  { %680 = vmatmul.mubr.bf16.vlgmr.msra.gmra.mxu0 %v120_v45 }
  0x57   :  { %1301 = vmatpush3.bf16.msra.mxu0 %v1391_v48  ;;  %720 = vmatmul.mubr.bf16.vlgmr.msra.gmra.mxu1 %v122_v49  ;;  %p1509_p9 = por %p1508_p8, %p1507_p7 }
  0x58   :  { %1302 = vmatprep.subr.bf16.mxu0 %v1393_v50  ;;  %1323 = vmatpush3.bf16.msra.mxu1 %v1392_v52 }
  0x59   :  { %1324 = vmatprep.subr.bf16.mxu1 %v1394_v53  ;;  %759 = vmatprep.mubr.bf16.mxu0 %v125_v22  ;;  %p1510_p10 = pnand %p1509_p9, %p1503_p6 }
  0x5a   :  { %799 = vmatprep.mubr.bf16.mxu1 %v127_v25 }
  0x5b   :  { %1303 = vmatpush3.bf16.msra.mxu0 %v1395_v54 }
  0x5c   :  { %1304 = vmatprep.subr.bf16.mxu0 %v1397_v55  ;;  %1325 = vmatpush3.bf16.msra.mxu1 %v1396_v56 }
  0x5d   :  { %1326 = vmatprep.subr.bf16.mxu1 %v1398_v57  ;;  %v1561_v57 = vmov 0.0  }
  0x5f   :  { %1305 = vmatpush3.bf16.msra.mxu0 %v1399_v58 }
  0x60   :  { %1306 = vmatprep.subr.bf16.mxu0 %v1401_v59  ;;  %1327 = vmatpush3.bf16.msra.mxu1 %v1400_v60 }
  0x61   :  { %1328 = vmatprep.subr.bf16.mxu1 %v1402_v61 }
  0x63   :  { %1307 = vmatpush3.bf16.msra.mxu0 %v1403_v62 }
  0x64   :  { %1308 = vmatprep.subr.bf16.mxu0 %v1405_v63  ;;  %1329 = vmatpush3.bf16.msra.mxu1 %v1404_v0 }
  0x65   :  { %1330 = vmatprep.subr.bf16.mxu1 %v1406_v1 }
  0x67   :  { %1309 = vmatpush3.bf16.msra.mxu0 %v1407_v2 }
  0x68   :  { %1310 = vmatprep.subr.bf16.mxu0 %v1409_v3  ;;  %1331 = vmatpush3.bf16.msra.mxu1 %v1408_v4 }
  0x69   :  { %1332 = vmatprep.subr.bf16.mxu1 %v1410_v5 }
  0x6b   :  { %1311 = vmatpush3.bf16.msra.mxu0 %v1411_v6 }
  0x6c   :  { %1312 = vmatprep.subr.bf16.mxu0 %v1413_v7  ;;  %1333 = vmatpush3.bf16.msra.mxu1 %v1412_v8 }
  0x6d   :  { %1334 = vmatprep.subr.bf16.mxu1 %v1414_v9 }
  0x6f   :  { %1313 = vmatpush3.bf16.msra.mxu0 %v1415_v10 }
  0x70   :  { %1314 = vmatprep.subr.bf16.mxu0 %v1417_v11  ;;  %1335 = vmatpush3.bf16.msra.mxu1 %v1416_v12 }
  0x71   :  { %1336 = vmatprep.subr.bf16.mxu1 %v1418_v13 }
  0x73   :  { %1315 = vmatpush3.bf16.msra.mxu0 %v1419_v15 }
  0x74   :  { %1337 = vmatpush3.bf16.msra.mxu1 %v1420_v18 }
  0x76   :  { %760 = vmatmul.mubr.bf16.vlgmr.msra.gmra.mxu0 %v124_v21 }
  0x77   :  { %800 = vmatmul.mubr.bf16.vlgmr.msra.gmra.mxu1 %v126_v24 }
 0x116   :  { %v1272_v27 = vpop.f32.mrf.mxu0 }
 0x117   :  { %v1294_v28 = vpop.f32.mrf.mxu1 }
 0x118   :  { %v1273_v29 = vpop.f32.mrf.mxu0 }
 0x119   :  { %v1295_v31 = vpop.f32.mrf.mxu1  ;;  %v1274_v36 = vadd.f32 %v1273_v29, %v1272_v27 }
 0x11a   :  { %v1275_v32 = vpop.f32.mrf.mxu0  ;;  %v1296_v40 = vadd.f32 %v1295_v31, %v1294_v28 }
 0x11b   :  { %v1297_v33 = vpop.f32.mrf.mxu1  ;;  %v682_v38 = vadd.f32 %v1274_v36, %v1186_v37 }
 0x11c   :  { %v1276_v34 = vpop.f32.mrf.mxu0 }
 0x11d   :  { %v1298_v35 = vpop.f32.mrf.mxu1  ;;  %v722_v46 = vadd.f32 %v1296_v40, %v682_v38 }
 0x136   :  { %v1316_v41 = vpop.f32.mrf.mxu0 }
 0x137   :  { %v1338_v42 = vpop.f32.mrf.mxu1 }
 0x138   :  { %v1317_v45 = vpop.f32.mrf.mxu0 }
 0x139   :  { %v1318_v48 = vadd.f32 %v1317_v45, %v1316_v41  ;;  %v1339_v49 = vpop.f32.mrf.mxu1 }
 0x13a   :  { %v1319_v50 = vpop.f32.mrf.mxu0  ;;  %v1340_v52 = vadd.f32 %v1339_v49, %v1338_v42 }
 0x13b   :  { %v762_v51 = vadd.f32 %v1318_v48, %v722_v46  ;;  %v1341_v53 = vpop.f32.mrf.mxu1 }
 0x13c   :  { %v1320_v54 = vpop.f32.mrf.mxu0 }
 0x13d   :  { %v802_v55 = vadd.f32 %v1340_v52, %v762_v51  ;;  %v1342_v56 = vpop.f32.mrf.mxu1 }
 0x13f   :  { %807 = vst [vmem:[#allocation10] sm:$0x3] %v802_v55  ;;  %vm808_vm0 = vcmp.le.f32.partialorder %v802_v55, 0.0 }
 0x140   :  { %v1251_v58 = vsel %vm808_vm0, 1.0, %v1561_v57 }
 0x141   :  { %1513 = shalt.err (!%p1510_p10)
}
 0x142   :  { %1164 = dma.vmem_to_hbm [thread:$0]  %s1162_s18, 32, %s1787_s5, [#allocation4]   ;;  %883 = vperm.xlu0 %1355, %v1251_v58   ;;  %v1666_v59 = vsub.s32 0, %v1610_v30  ;;  %v1669_v60 = vsub.s32 1, %v1610_v30  ;;  %v1671_v61 = vld [vmem:[#allocation7] ss:$4 sm:$0xff] }
 0x143   :  { %v823_v62 = vsub.s32 2, %v1610_v30  ;;  %v827_v63 = vsub.s32 3, %v1610_v30  ;;  %v1682_v4 = vsub.s32 4, %v1610_v30  ;;  %v1685_v5 = vsub.s32 5, %v1610_v30  ;;  %v1695_v10 = vld [vmem:[#allocation7 + $0x1] ss:$4 sm:$0xff] }
 0x144   :  { %v816_v0 = vrot.slane %v1671_v61, %v1666_v59  ;;  %v820_v1 = vrot.slane %v1671_v61, %v1669_v60  ;;  %v1688_v6 = vsub.s32 6, %v1610_v30  ;;  %v1691_v7 = vsub.s32 7, %v1610_v30  ;;  %v1707_v17 = vld [vmem:[#allocation7 + $0x2] ss:$4 sm:$0xff]  ;;  %v1071_v29 = vld [vmem:[#allocation7 + $0x3] ss:$4 sm:$0xff] }
 0x145   :  { %v824_v2 = vrot.slane %v1671_v61, %v823_v62  ;;  %v828_v3 = vrot.slane %v1671_v61, %v827_v63  ;;  %v832_v11 = vrot.slane %v1671_v61, %v1682_v4  ;;  %v836_v12 = vrot.slane %v1671_v61, %v1685_v5  ;;  %s1562_s5 = smov [#allocation11]  }
 0x146   :  { %v853_v8 = vmul.f32 %v816_v0, %v1616_v39  ;;  %v854_v9 = vmul.f32 %v820_v1, %v1620_v43  ;;  %v906_v30 = vrot.slane %v1695_v10, %v1666_v59  ;;  %v910_v15 = vrot.slane %v1695_v10, %v1669_v60  ;;  %s1171_s21 = sshll.u32 %s1562_s5, 4  ;;  %s1172_s21 = int_to_ptr.vmem [resolvable:$true] %s1171_s21 }
 0x147   :  { %v855_v13 = vmul.f32 %v824_v2, %v1623_v44  ;;  %v856_v14 = vmul.f32 %v828_v3, %v1631_v47  ;;  %v840_v18 = vrot.slane %v1671_v61, %v1688_v6  ;;  %v844_v21 = vrot.slane %v1671_v61, %v1691_v7  ;;  %s1522_s22 = scalar_lea.vmem %s1172_s21, 256  ;;  %p1527_p12 = scmp.lt.s32.totalorder %s1172_s21, %s1172_s21 }
 0x148   :  { %v914_v22 = vrot.slane %v1695_v10, %v823_v62  ;;  %v918_v24 = vrot.slane %v1695_v10, %v827_v63  ;;  %v857_v25 = vmul.f32 %v832_v11, %v1638_v16  ;;  %v858_v26 = vmul.f32 %v836_v12, %v1642_v19  ;;  %p1523_p11 = scmp.ne.s32.totalorder %s1172_s21, %s1522_s22  ;;  %p1528_p13 = scmp.lt.s32.totalorder %s1522_s22, %s1522_s22 }
 0x149   :  { %v861_v27 = vadd.f32 %v855_v13, %v853_v8  ;;  %v862_v28 = vadd.f32 %v856_v14, %v854_v9  ;;  %v922_v31 = vrot.slane %v1695_v10, %v1682_v4  ;;  %v926_v32 = vrot.slane %v1695_v10, %v1685_v5 }
 0x14a   :  { %v991_v33 = vrot.slane %v1707_v17, %v1666_v59  ;;  %v995_v34 = vrot.slane %v1707_v17, %v1669_v60  ;;  %v930_v35 = vrot.slane %v1695_v10, %v1688_v6  ;;  %v934_v36 = vrot.slane %v1695_v10, %v1691_v7  ;;  %p1529_p0 = por %p1528_p13, %p1527_p12 }
 0x14b   :  { %v999_v37 = vrot.slane %v1707_v17, %v823_v62  ;;  %v1003_v38 = vrot.slane %v1707_v17, %v827_v63  ;;  %v1076_v40 = vrot.slane %v1071_v29, %v1666_v59  ;;  %v1080_v41 = vrot.slane %v1071_v29, %v1669_v60 }
 0x14c   :  { %v1084_v42 = vrot.slane %v1071_v29, %v823_v62  ;;  %v1088_v45 = vrot.slane %v1071_v29, %v827_v63  ;;  %v943_v46 = vmul.f32 %v906_v30, %v1616_v39  ;;  %v944_v48 = vmul.f32 %v910_v15, %v1620_v43  ;;  %p1530_p1 = pnand %p1529_p0, %p1523_p11 }
 0x14d   :  { %v945_v49 = vmul.f32 %v914_v22, %v1623_v44  ;;  %v946_v50 = vmul.f32 %v918_v24, %v1631_v47  ;;  %v1007_v51 = vrot.slane %v1707_v17, %v1682_v4  ;;  %v1011_v52 = vrot.slane %v1707_v17, %v1685_v5  ;;  %v867_v24 = vld [vmem:[#allocation8] sm:$0x3] }
 0x14e   :  { %v1028_v53 = vmul.f32 %v991_v33, %v1616_v39  ;;  %v1029_v54 = vmul.f32 %v995_v34, %v1620_v43  ;;  %v1030_v55 = vmul.f32 %v999_v37, %v1623_v44  ;;  %v1031_v56 = vmul.f32 %v1003_v38, %v1631_v47  ;;  %v1042_v37 = vld [vmem:[#allocation8 + $0x4] sm:$0x3]  ;;  %v1127_v38 = vld [vmem:[#allocation8 + $0x6] sm:$0x3] }
 0x14f   :  { %v1092_v57 = vrot.slane %v1071_v29, %v1682_v4  ;;  %v1096_v58 = vrot.slane %v1071_v29, %v1685_v5  ;;  %v1113_v61 = vmul.f32 %v1076_v40, %v1616_v39  ;;  %v1114_v62 = vmul.f32 %v1080_v41, %v1620_v43 }
 0x150   :  { %v1115_v63 = vmul.f32 %v1084_v42, %v1623_v44  ;;  %v1116_v0 = vmul.f32 %v1088_v45, %v1631_v47  ;;  %v947_v1 = vmul.f32 %v922_v31, %v1638_v16  ;;  %v948_v2 = vmul.f32 %v926_v32, %v1642_v19 }
 0x151   :  { %v951_v3 = vadd.f32 %v945_v49, %v943_v46  ;;  %v952_v8 = vadd.f32 %v946_v50, %v944_v48  ;;  %v1015_v9 = vrot.slane %v1707_v17, %v1688_v6  ;;  %v1019_v4 = vrot.slane %v1707_v17, %v1691_v7 }
 0x152   :  { %v1032_v39 = vmul.f32 %v1007_v51, %v1638_v16  ;;  %v1033_v43 = vmul.f32 %v1011_v52, %v1642_v19  ;;  %v1036_v5 = vadd.f32 %v1030_v55, %v1028_v53  ;;  %v1037_v44 = vadd.f32 %v1031_v56, %v1029_v54 }
 0x153   :  { %v1100_v47 = vrot.slane %v1071_v29, %v1688_v6  ;;  %v1104_v10 = vrot.slane %v1071_v29, %v1691_v7  ;;  %v1117_v11 = vmul.f32 %v1092_v57, %v1638_v16  ;;  %v1118_v12 = vmul.f32 %v1096_v58, %v1642_v19  ;;  %v957_v7 = vld [vmem:[#allocation8 + $0x2] sm:$0x3] }
 0x154   :  { %v1121_v13 = vadd.f32 %v1115_v63, %v1113_v61  ;;  %v1122_v14 = vadd.f32 %v1116_v0, %v1114_v62  ;;  %v859_v30 = vmul.f32 %v840_v18, %v1645_v20  ;;  %v860_v15 = vmul.f32 %v844_v21, %v1653_v23 }
 0x155   :  { %v863_v17 = vadd.f32 %v861_v27, %v857_v25  ;;  %v864_v22 = vadd.f32 %v862_v28, %v858_v26  ;;  %v949_v31 = vmul.f32 %v930_v35, %v1645_v20  ;;  %v950_v32 = vmul.f32 %v934_v36, %v1653_v23 }
 0x156   :  { %v953_v6 = vadd.f32 %v951_v3, %v947_v1  ;;  %v954_v33 = vadd.f32 %v952_v8, %v948_v2  ;;  %v1034_v16 = vmul.f32 %v1015_v9, %v1645_v20  ;;  %v1035_v19 = vmul.f32 %v1019_v4, %v1653_v23 }
 0x157   :  { %v1038_v29 = vadd.f32 %v1036_v5, %v1032_v39  ;;  %v1039_v34 = vadd.f32 %v1037_v44, %v1033_v43  ;;  %v1119_v18 = vmul.f32 %v1100_v47, %v1645_v20  ;;  %v1120_v21 = vmul.f32 %v1104_v10, %v1653_v23 }
 0x158   :  { %v1123_v25 = vadd.f32 %v1121_v13, %v1117_v11  ;;  %v1124_v26 = vadd.f32 %v1122_v14, %v1118_v12  ;;  %v865_v27 = vadd.f32 %v863_v17, %v859_v30  ;;  %v866_v28 = vadd.f32 %v864_v22, %v860_v15 }
 0x159   :  { %v872_v35 = vrot.slane %v867_v24, %v1666_v59  ;;  %v876_v36 = vrot.slane %v867_v24, %v1669_v60  ;;  %v955_v40 = vadd.f32 %v953_v6, %v949_v31  ;;  %v956_v41 = vadd.f32 %v954_v33, %v950_v32 }
 0x15a   :  { %v962_v42 = vrot.slane %v957_v7, %v1666_v59  ;;  %v966_v45 = vrot.slane %v957_v7, %v1669_v60  ;;  %v1040_v46 = vadd.f32 %v1038_v29, %v1034_v16  ;;  %v1041_v48 = vadd.f32 %v1039_v34, %v1035_v19 }
 0x15b   :  { %v1047_v20 = vrot.slane %v1042_v37, %v1666_v59  ;;  %v1051_v23 = vrot.slane %v1042_v37, %v1669_v60  ;;  %v1125_v49 = vadd.f32 %v1123_v25, %v1119_v18  ;;  %v1126_v50 = vadd.f32 %v1124_v26, %v1120_v21 }
 0x15c   :  { %v1132_v51 = vrot.slane %v1127_v38, %v1666_v59  ;;  %v1136_v52 = vrot.slane %v1127_v38, %v1669_v60  ;;  %v879_v53 = vadd.f32 %v872_v35, %v865_v27  ;;  %v880_v54 = vadd.f32 %v876_v36, %v866_v28 }
 0x15d   :  { %v969_v55 = vadd.f32 %v962_v42, %v955_v40  ;;  %v970_v56 = vadd.f32 %v966_v45, %v956_v41  ;;  %v1054_v57 = vadd.f32 %v1047_v20, %v1040_v46  ;;  %v1055_v58 = vadd.f32 %v1051_v23, %v1041_v48 }
 0x15e   :  { %v1139_v61 = vadd.f32 %v1132_v51, %v1125_v49  ;;  %v1140_v62 = vadd.f32 %v1136_v52, %v1126_v50 }
 0x1bd   :  { %v884_v63 = vpop.permute.xlu0 %883 }
 0x1be   :  { %v886_v0 = vmul.f32 %v884_v63, %v879_v53  ;;  %v887_v1 = vmul.f32 %v884_v63, %v880_v54  ;;  %v971_v2 = vmul.f32 %v969_v55, %v884_v63  ;;  %v972_v3 = vmul.f32 %v970_v56, %v884_v63 }
 0x1bf   :  { %v1056_v8 = vmul.f32 %v1054_v57, %v884_v63  ;;  %v1057_v9 = vmul.f32 %v1055_v58, %v884_v63  ;;  %v1141_v59 = vmul.f32 %v1139_v61, %v884_v63  ;;  %v1142_v4 = vmul.f32 %v1140_v62, %v884_v63 }
 0x1c0   :  { %v890_v60 = vcombine.low %v886_v0, %v887_v1  ;;  %v975_v39 = vcombine.low %v971_v2, %v972_v3 }
 0x1c1   :  { %v1060_v43 = vcombine.low %v1056_v8, %v1057_v9  ;;  %v1145_v5 = vcombine.low %v1141_v59, %v1142_v4 }
 0x1c2   :  { %1252 = vst.sshfl [vmem:[#allocation11] sm:$0x33 pattern:$0x76325410] %v890_v60 }
 0x1c3   :  { %1253 = vst.sshfl [vmem:[#allocation11 + $0x4] sm:$0x33 pattern:$0x76325410] %v975_v39 }
 0x1c4   :  { %1254 = vst.sshfl [vmem:[#allocation11 + $0x8] sm:$0x33 pattern:$0x76325410] %v1060_v43 }
 0x1c5   :  { %1255 = vst.sshfl [vmem:[#allocation11 + $0xc] sm:$0x33 pattern:$0x76325410] %v1145_v5 }
 0x1c6   :  { %1533 = shalt.err (!%p1530_p1)
}
 0x1c7   :  { %1174 = dma.vmem_to_hbm [thread:$0]  %s1172_s21, 256, %s1788_s6, [#allocation12]  }
 0x1c8   :  { %1548 = dma.done.wait [#allocation4], 32  }
 0x1c9   :  { %1549 = vsyncadd [#allocation4], 4294967264 }
 0x1ca   :  { %1550 = dma.done.wait [#allocation12], 256  }
 0x1cb   :  { %1551 = vsyncadd [#allocation12], 4294967040 }
 0x1cc   :  { %1181 = vsyncpa [#allocation3], 1 }
 0x1cd   :  { %1182 = vsyncpa [#allocation6], 1 }
 0x1ce   :  { %1183 = vsyncpa [#allocation9], 1 }
 0x1cf   :  { %1184 = vsyncpa [#allocation4], 1 }
 0x1d0   :  { %1185 = vsyncpa [#allocation12], 1 }

</bundles_post_ra>
